<compile_context>
chip_gen: v7x
topology: tpu7x:2x2x1
jax: 0.10.0
libtpu: 0.0.40
codegen_flags: <defaults>
</compile_context>

<pallas_src>
import functools

import jax
import jax.numpy as jnp
import numpy as np
from jax.experimental import pallas as pl
from jax.experimental.pallas import tpu as pltpu

_MASK_VALUE = -1e30  # large-negative instead of -inf; exp(mask - m) underflows to 0


def _vmem_budget_bytes():
    """~80% of the per-core physical VMEM (v5e/v6e: ~102 MiB, v7x: ~51 MiB)."""
    cap = 128 << 20
    try:
        info = pltpu.get_tpu_info()
        cap = int(getattr(info, "vmem_capacity_bytes", cap) or cap)
    except Exception:
        pass
    return int(0.8 * cap)


def _largest_aligned_divisor(b, align, row_bytes, cap, max_rows):
    """Largest divisor of b that is a multiple of `align`, uses <= cap bytes and
    <= max_rows rows.  Falls back to the smallest aligned divisor, then to b."""
    fitting = None
    smallest = None
    t = align
    while t <= b:
        if b % t == 0:
            if smallest is None:
                smallest = t
            if t <= max_rows and t * row_bytes <= cap:
                fitting = t
        t += align
    if fitting is not None:
        return fitting
    if smallest is not None:
        return smallest
    return b


def _normalize_pack_kernel(v1_ref, v2_ref, z_ref, *, eps, sqrt_inv_temp,
                           compute_dtype):
    e1 = v1_ref[...].astype(jnp.float32)                       # (TBn, D)
    e2 = v2_ref[...].astype(jnp.float32)
    # Per-row clamp (eps^2 on the squared norm); identical to clamping the norm
    # product for non-degenerate rows.  sqrt(1/T) folded into both operands so
    # z @ z^T is already temperature-scaled.
    s1 = sqrt_inv_temp * jax.lax.rsqrt(
        jnp.maximum(jnp.sum(e1 * e1, axis=-1, keepdims=True), eps * eps))
    s2 = sqrt_inv_temp * jax.lax.rsqrt(
        jnp.maximum(jnp.sum(e2 * e2, axis=-1, keepdims=True), eps * eps))
    z_ref[0, :, :] = (e1 * s1).astype(compute_dtype)
    z_ref[1, :, :] = (e2 * s2).astype(compute_dtype)


def _infonce_rows_kernel(z_ref, out_ref):
    n, _ = z_ref.shape                         # resident (2B, D)
    b = n // 2
    tb = out_ref.shape[1]                      # rows per strip
    v = pl.program_id(0)                       # which view the strip belongs to
    j = pl.program_id(1)                       # strip index within the view

    row_start = v * b + j * tb                 # global first row of this strip
    if tb % 8 == 0:
        row_start = pl.multiple_of(row_start, 8)
    zr = z_ref[pl.ds(row_start, tb), :]        # (TB, D) slice of the resident z

    # Single fused MXU matmul: (TB, D) x (D, 2B) -> (TB, 2B), f32 accumulation.
    s = jax.lax.dot_general(zr, z_ref[...], (((1,), (1,)), ((), ())),
                            preferred_element_type=jnp.float32)

    # One lane-iota difference tensor drives both the self mask and the
    # positive-column extraction (no per-half (TB,B) int32 iota pairs).
    col = jax.lax.broadcasted_iota(jnp.int32, (tb, n), 1)
    rowg = jax.lax.broadcasted_iota(jnp.int32, (tb, 1), 0) + row_start
    diff = col - rowg                          # (TB, 2B)
    poff = b * (1 - 2 * v)                     # +B for view 0, -B for view 1

    s = jnp.where(diff == 0, _MASK_VALUE, s)   # mask only the self similarity
    # Positive logit = similarity to the paired row (already /T).  It also
    # remains unmasked inside the cross-view half, so it is counted twice in
    # the denominator - matches the reference semantics, keep it.
    pos = jnp.sum(jnp.where(diff == poff, s, 0.0), axis=-1, keepdims=True)

    # Numerically stable LSE; max must include the positive logit to avoid
    # overflow at small temperatures.
    m = jnp.maximum(jnp.max(s, axis=-1, keepdims=True), pos)
    se = (jnp.sum(jnp.exp(s - m), axis=-1, keepdims=True) + jnp.exp(pos - m))
    out_ref[0, :, :] = m + jnp.log(se) - pos   # per-row loss


def infonce_loss(embeddings_view1, embeddings_view2, temperature=0.1, eps=1e-8,
                 compute_dtype=jnp.bfloat16):
    assert embeddings_view1.shape == embeddings_view2.shape
    assert embeddings_view1.ndim == 2
    b, d = embeddings_view1.shape
    n = 2 * b
    cdt = jnp.dtype(compute_dtype)
    csize = cdt.itemsize
    esize = jnp.dtype(embeddings_view1.dtype).itemsize

    budget = _vmem_budget_bytes()
    align = max(8, 8 * (4 // csize))   # 8 for f32, 16 for bf16, 32 for int8/fp8

    # ---------------- kernel 1: normalize + pack (O(N*D)) ----------------
    # Large tiles (>= 1-4 MiB moved per grid step) - this kernel is pure HBM
    # bandwidth and small tiles are grid-overhead bound.
    row_bytes1 = d * (4 * esize + 4 * csize + 24)  # dbl-buffered in/out + f32 temps
    tbn = _largest_aligned_divisor(b, align, row_bytes1,
                                   cap=min(16 << 20, budget // 4), max_rows=4096)
    vmem_norm = int(min(budget, max(24 << 20, tbn * row_bytes1 + (4 << 20))))
    nk = functools.partial(_normalize_pack_kernel,
                           eps=float(eps),
                           sqrt_inv_temp=float(1.0 / float(temperature)) ** 0.5,
                           compute_dtype=cdt)
    z = pl.pallas_call(
        nk,
        out_shape=jax.ShapeDtypeStruct((2, b, d), cdt),
        grid_spec=pltpu.PrefetchScalarGridSpec(
            num_scalar_prefetch=0,
            grid=(b // tbn,),
            in_specs=[pl.BlockSpec((tbn, d), lambda i: (i, 0)),
                      pl.BlockSpec((tbn, d), lambda i: (i, 0))],
            out_specs=pl.BlockSpec((2, tbn, d), lambda i: (0, i, 0)),
        ),
        compiler_params=pltpu.CompilerParams(
            dimension_semantics=("parallel",),
            vmem_limit_bytes=vmem_norm),
    )(embeddings_view1, embeddings_view2)

    z = z.reshape(n, d)   # free: contiguous (2,B,D) -> (2B,D), no HBM copy

    # ------------- kernel 2: fused row-tiled similarity + LSE (O(N^2*D)) -------------
    resident = 2 * n * d * csize            # resident z (pipeliner double-buffers it)
    row_bytes2 = 6 * n * 4 + d * csize      # live (TB, 2B) f32/int32 temporaries + slice
    cap2 = max(1 << 20, (budget - resident) * 2 // 3)
    tb = _largest_aligned_divisor(b, align, row_bytes2, cap=cap2, max_rows=512)
    vmem_main = int(min(budget, max(24 << 20,
                                    resident + tb * row_bytes2 + (4 << 20))))
    cost = pl.CostEstimate(flops=2 * n * n * d,
                           transcendentals=n * (n + 2),
                           bytes_accessed=n * d * csize + n * 4)
    loss_rows = pl.pallas_call(
        _infonce_rows_kernel,
        out_shape=jax.ShapeDtypeStruct((2, b, 1), jnp.float32),
        grid_spec=pltpu.PrefetchScalarGridSpec(
            num_scalar_prefetch=0,
            grid=(2, b // tb),
            in_specs=[pl.BlockSpec((n, d), lambda v, j: (0, 0))],   # resident columns
            out_specs=pl.BlockSpec((1, tb, 1), lambda v, j: (v, j, 0)),
        ),
        compiler_params=pltpu.CompilerParams(
            dimension_semantics=("parallel", "parallel"),
            vmem_limit_bytes=vmem_main),
        cost_estimate=cost,
    )(z)
    # TODO(synk): single-buffer the resident z (pipeline_mode=pl.Buffered(1)) once
    #   it is reliable across jax versions, and add a flash-style column-tiled LSE
    #   path (third grid axis + running max/sum scratch) when 2B*D no longer fits
    #   comfortably in the per-core VMEM budget (matters first on v7x, 64 MiB/TC).

    return jnp.mean(loss_rows)   # tiny glue: mean over the 2B per-row losses


def _infonce_reference(e1, e2, temperature=0.1, eps=1e-8):
    """float64 numpy ground truth of the intended forward pass."""
    e1 = np.asarray(e1, dtype=np.float64)
    e2 = np.asarray(e2, dtype=np.float64)
    e = np.concatenate([e1, e2], axis=0)
    b = e1.shape[0]
    n = e.shape[0]
    nrm = np.linalg.norm(e, axis=-1, keepdims=True)
    sim = (e @ e.T) / np.maximum(nrm * nrm.T, eps)
    pos = np.concatenate([np.diag(sim, b), np.diag(sim, -b)])
    mask = ~np.eye(n, dtype=bool)
    neg = sim[mask].reshape(n, n - 1)
    logits = np.concatenate([pos[:, None], neg], axis=1) / temperature
    mx = logits.max(axis=1, keepdims=True)
    lse = mx[:, 0] + np.log(np.exp(logits - mx).sum(axis=1))
    return float(np.mean(lse - logits[:, 0]))


def _check(loss, ref, atol=3e-2, rtol=3e-2):
    loss = float(loss)
    assert np.isfinite(loss), loss
    # bf16 MXU operands (f32 accumulation) vs float64 reference -> modest slack.
    assert abs(loss - ref) <= atol + rtol * abs(ref), (loss, ref)


if __name__ == "__main__":
    key = jax.random.PRNGKey(0)
    k1, k2, k3, k4 = jax.random.split(key, 4)

    # Small config matching the module's (B, D) embedding interface.
    B, D = 16, 32
    v1 = jax.random.normal(k1, (B, D), dtype=jnp.float32)
    v2 = jax.random.normal(k2, (B, D), dtype=jnp.float32)
    loss = jax.block_until_ready(infonce_loss(v1, v2, temperature=0.1))
    _check(loss, _infonce_reference(v1, v2, temperature=0.1))

    # Larger config exercising multiple row strips per view
    # (B=768 -> TB=384 -> grid (2, 2), dynamic strip offsets within the resident z).
    B2, D2 = 768, 256
    w1 = jax.random.normal(k3, (B2, D2), dtype=jnp.float32)
    w2 = jax.random.normal(k4, (B2, D2), dtype=jnp.float32)
    loss2 = jax.block_until_ready(infonce_loss(w1, w2, temperature=0.1))
    _check(loss2, _infonce_reference(w1, w2, temperature=0.1))

    print("KERNEL_OK")
</pallas_src>

<mosaic_0001>
module attributes {stable_mosaic.version = 11 : i64} {
  func.func @_normalize_pack_kernel(%arg0: i32, %arg1: memref<16x32xf32, #tpu.memory_space<vmem>>, %arg2: memref<16x32xf32, #tpu.memory_space<vmem>>, %arg3: memref<2x16x32xbf16, #tpu.memory_space<vmem>>) attributes {dimension_semantics = [#tpu.dimension_semantics<parallel>], iteration_bounds = array<i64: 1>, scalar_prefetch = 0 : i64, scratch_operands = 0 : i64, tpu.core_type = #tpu.core_type<tc>, window_params = [{transform_indices = @transform_0, window_bounds = array<i64: 16, 32>}, {transform_indices = @transform_1, window_bounds = array<i64: 16, 32>}, {transform_indices = @transform_2, window_bounds = array<i64: 2, 16, 32>}]} {
    %c0 = arith.constant 0 : index
    %c0_0 = arith.constant 0 : index
    %0 = vector.load %arg1[%c0, %c0_0] : memref<16x32xf32, #tpu.memory_space<vmem>>, vector<16x32xf32>
    %c0_1 = arith.constant 0 : index
    %c0_2 = arith.constant 0 : index
    %1 = vector.load %arg2[%c0_1, %c0_2] : memref<16x32xf32, #tpu.memory_space<vmem>>, vector<16x32xf32>
    %2 = arith.mulf %0, %0 : vector<16x32xf32>
    %cst = arith.constant dense<0.000000e+00> : vector<16xf32>
    %3 = vector.multi_reduction <add>, %2, %cst [1] : vector<16x32xf32> to vector<16xf32>
    %4 = vector.shape_cast %3 : vector<16xf32> to vector<16x1xf32>
    %cst_3 = arith.constant 1.000000e-16 : f32
    %5 = vector.broadcast %cst_3 : f32 to vector<16x1xf32>
    %6 = arith.maximumf %4, %5 : vector<16x1xf32>
    %7 = math.rsqrt %6 : vector<16x1xf32>
    %cst_4 = arith.constant 3.1622777 : f32
    %8 = vector.broadcast %cst_4 : f32 to vector<16x1xf32>
    %9 = arith.mulf %8, %7 : vector<16x1xf32>
    %10 = arith.mulf %1, %1 : vector<16x32xf32>
    %cst_5 = arith.constant dense<0.000000e+00> : vector<16xf32>
    %11 = vector.multi_reduction <add>, %10, %cst_5 [1] : vector<16x32xf32> to vector<16xf32>
    %12 = vector.shape_cast %11 : vector<16xf32> to vector<16x1xf32>
    %cst_6 = arith.constant 1.000000e-16 : f32
    %13 = vector.broadcast %cst_6 : f32 to vector<16x1xf32>
    %14 = arith.maximumf %12, %13 : vector<16x1xf32>
    %15 = math.rsqrt %14 : vector<16x1xf32>
    %cst_7 = arith.constant 3.1622777 : f32
    %16 = vector.broadcast %cst_7 : f32 to vector<16x1xf32>
    %17 = arith.mulf %16, %15 : vector<16x1xf32>
    %18 = vector.broadcast %9 : vector<16x1xf32> to vector<16x32xf32>
    %19 = arith.mulf %0, %18 : vector<16x32xf32>
    %20 = arith.truncf %19 : vector<16x32xf32> to vector<16x32xbf16>
    %c0_8 = arith.constant 0 : index
    %c0_9 = arith.constant 0 : index
    %c0_10 = arith.constant 0 : index
    %21 = vector.load %arg3[%c0_8, %c0_9, %c0_10] : memref<2x16x32xbf16, #tpu.memory_space<vmem>>, vector<1x16x32xbf16>
    %22 = vector.shape_cast %21 : vector<1x16x32xbf16> to vector<16x32xbf16>
    %23 = vector.shape_cast %20 : vector<16x32xbf16> to vector<1x16x32xbf16>
    tpu.vector_store %arg3[%c0_8, %c0_9, %c0_10], %23 {strides = array<i32>} : memref<2x16x32xbf16, #tpu.memory_space<vmem>>, vector<1x16x32xbf16>,
    %24 = vector.broadcast %17 : vector<16x1xf32> to vector<16x32xf32>
    %25 = arith.mulf %1, %24 : vector<16x32xf32>
    %26 = arith.truncf %25 : vector<16x32xf32> to vector<16x32xbf16>
    %c1 = arith.constant 1 : index
    %c0_11 = arith.constant 0 : index
    %c0_12 = arith.constant 0 : index
    %27 = vector.load %arg3[%c1, %c0_11, %c0_12] : memref<2x16x32xbf16, #tpu.memory_space<vmem>>, vector<1x16x32xbf16>
    %28 = vector.shape_cast %27 : vector<1x16x32xbf16> to vector<16x32xbf16>
    %29 = vector.shape_cast %26 : vector<16x32xbf16> to vector<1x16x32xbf16>
    tpu.vector_store %arg3[%c1, %c0_11, %c0_12], %29 {strides = array<i32>} : memref<2x16x32xbf16, #tpu.memory_space<vmem>>, vector<1x16x32xbf16>,
    return
  }
  func.func @transform_0(%arg0: i32) -> (i32, i32) {
    %c0_i32 = arith.constant 0 : i32
    %c0_i32_0 = arith.constant 0 : i32
    return %arg0, %c0_i32 : i32, i32
  }
  func.func @transform_1(%arg0: i32) -> (i32, i32) {
    %c0_i32 = arith.constant 0 : i32
    %c0_i32_0 = arith.constant 0 : i32
    return %arg0, %c0_i32 : i32, i32
  }
  func.func @transform_2(%arg0: i32) -> (i32, i32, i32) {
    %c0_i32 = arith.constant 0 : i32
    %c0_i32_0 = arith.constant 0 : i32
    %c0_i32_1 = arith.constant 0 : i32
    return %c0_i32, %arg0, %c0_i32_0 : i32, i32, i32
  }
}

</mosaic_0001>

<bundles_post_ra>
// kernel: tpu_custom_call.1
= control target key start
LH: loop header
LB: loop body
LE: loop exit
PB: predicated region body
PF: predicated region fallthrough
CT: control target
= control target key end

     0   :  { %7 = vsyncpa [#allocation3], 0  ;;  %s274_s0 = inlined_call_operand.hbm [shape: f32[16,32], index: 0, kind: input, shape index: {}]   ;;  %s275_s1 = inlined_call_operand.hbm [shape: f32[16,32], index: 1, kind: input, shape index: {}]   ;;  %s276_s2 = inlined_call_operand.hbm [shape: bf16[2,16,32], index: 2, kind: output, shape index: {}]  }
   0x1   :  { %8 = vsyncpa [#allocation6], 0 }
   0x2   :  { %9 = vsyncpa [#allocation4], 0  ;;  %s212_s9 = smov [#allocation2]   ;;  %s140_s13 = scalar_lea.hbm %s274_s0, 256 }
   0x3   :  { %s15_s10 = sshll.u32 %s212_s9, 4  ;;  %p141_p0 = scmp.ne.s32.totalorder %s274_s0, %s140_s13  ;;  %s16_s10 = int_to_ptr.vmem [resolvable:$true] %s15_s10 }
   0x4   :  { %p144_p1 = scmp.lt.u32.totalorder %s140_s13, %s274_s0 }
   0x6   :  { %p146_p2 = pnand %p144_p1, %p141_p0 }
   0x8   :  { %149 = shalt.err (!%p146_p2)
}
   0x9   :  { %s150_s18 = scalar_lea.vmem %s16_s10, 256  ;;  %p155_p4 = scmp.lt.s32.totalorder %s16_s10, %s16_s10 }
   0xa   :  { %p151_p3 = scmp.ne.s32.totalorder %s16_s10, %s150_s18  ;;  %p156_p5 = scmp.lt.s32.totalorder %s150_s18, %s150_s18 }
   0xc   :  { %p157_p6 = por %p156_p5, %p155_p4 }
   0xe   :  { %p158_p7 = pnand %p157_p6, %p151_p3 }
  0x10   :  { %161 = shalt.err (!%p158_p7)
}
  0x11   :  { %s213_s19 = smov 128   ;;  %s214_s20 = smov 8  }
  0x12   :  { %21 = dma.hbm_to_vmem [thread:$0]  %s274_s0, 256, %s16_s10, [#allocation3], %s213_s19, %s213_s19, %s214_s20  }
  0x13   :  { %s215_s23 = smov [#allocation5]   ;;  %s162_s27 = scalar_lea.hbm %s275_s1, 256 }
  0x14   :  { %s27_s24 = sshll.u32 %s215_s23, 4  ;;  %p163_p8 = scmp.ne.s32.totalorder %s275_s1, %s162_s27  ;;  %s28_s24 = int_to_ptr.vmem [resolvable:$true] %s27_s24 }
  0x15   :  { %p166_p9 = scmp.lt.u32.totalorder %s162_s27, %s275_s1 }
  0x17   :  { %p168_p10 = pnand %p166_p9, %p163_p8 }
  0x19   :  { %171 = shalt.err (!%p168_p10)
}
  0x1a   :  { %s172_s4 = scalar_lea.vmem %s28_s24, 256  ;;  %p177_p12 = scmp.lt.s32.totalorder %s28_s24, %s28_s24 }
  0x1b   :  { %p173_p11 = scmp.ne.s32.totalorder %s28_s24, %s172_s4  ;;  %p178_p13 = scmp.lt.s32.totalorder %s172_s4, %s172_s4 }
  0x1d   :  { %p179_p0 = por %p178_p13, %p177_p12 }
  0x1f   :  { %p180_p1 = pnand %p179_p0, %p173_p11 }
  0x21   :  { %183 = shalt.err (!%p180_p1)
}
  0x22   :  { %33 = dma.hbm_to_vmem [thread:$0]  %s275_s1, 256, %s28_s24, [#allocation6], %s213_s19, %s213_s19, %s214_s20  }
  0x23   :  { %206 = dma.done.wait [#allocation3], 256  }
  0x24   :  { %207 = vsyncadd [#allocation3], 4294967040 }
  0x25   :  { %208 = dma.done.wait [#allocation6], 256  }
  0x26   :  { %209 = vsyncadd [#allocation6], 4294967040  ;;  %v42_v0 = vld [vmem:[#allocation5] sm:$0xff]  ;;  %vm46_vm0 = vcmask 261120   ;;  %v40_v1 = vld [vmem:[#allocation2] sm:$0xff]  ;;  %vm83_vm1 = vcmask 257024  }
  0x27   :  { %v43_v2 = vld [vmem:[#allocation5 + $0x8] sm:$0xff]  ;;  %v59_v3 = vmul.f32 %v42_v0, %v42_v0  ;;  %v44_v4 = vmul.f32 %v40_v1, %v40_v1  ;;  %v41_v6 = vld [vmem:[#allocation2 + $0x8] sm:$0xff]  ;;  %s216_s1 = smov [#allocation7]  }
  0x28   :  { %v60_v5 = vmul.f32 %v43_v2, %v43_v2  ;;  %v45_v7 = vmul.f32 %v41_v6, %v41_v6  ;;  %s104_s6 = sshll.u32 %s216_s1, 4  ;;  %s105_s6 = int_to_ptr.vmem [resolvable:$true] %s104_s6 }
  0x29   :  { %v61_v8 = vsel %vm46_vm0, %v59_v3, 0.0  ;;  %v47_v9 = vsel %vm46_vm0, %v44_v4, 0.0  ;;  %s184_s7 = scalar_lea.vmem %s105_s6, 256  ;;  %p189_p3 = scmp.lt.s32.totalorder %s105_s6, %s105_s6 }
  0x2a   :  { %62 = vadd.xlane.f32.xlu1 %v61_v8  ;;  %48 = vadd.xlane.f32.xlu0 %v47_v9  ;;  %v64_v10 = vsel %vm46_vm0, %v60_v5, 0.0  ;;  %v50_v11 = vsel %vm46_vm0, %v45_v7, 0.0  ;;  %p185_p2 = scmp.ne.s32.totalorder %s105_s6, %s184_s7  ;;  %p190_p4 = scmp.lt.s32.totalorder %s184_s7, %s184_s7 }
  0x2c   :  { %p191_p5 = por %p190_p4, %p189_p3 }
  0x2e   :  { %65 = vadd.xlane.f32.xlu1 %v64_v10  ;;  %51 = vadd.xlane.f32.xlu0 %v50_v11  ;;  %p192_p6 = pnand %p191_p5, %p185_p2 }
  0xb7   :  { %v63_v12 = vpop.xlane.xlu1 %62  ;;  %v49_v13 = vpop.xlane.xlu0 %48 }
  0xb8   :  { %v67_v14 = vmax.f32 %v63_v12, 1e-16  ;;  %v53_v15 = vmax.f32 %v49_v13, 1e-16 }
  0xba   :  { %132 = vrsqrt.f32 %v67_v14 }
  0xbb   :  { %134 = vrsqrt.f32 %v53_v15  ;;  %v66_v16 = vpop.xlane.xlu1 %65  ;;  %v52_v17 = vpop.xlane.xlu0 %51 }
  0xbc   :  { %v68_v18 = vmax.f32 %v66_v16, 1e-16  ;;  %v54_v19 = vmax.f32 %v52_v17, 1e-16 }
  0xbe   :  { %136 = vrsqrt.f32 %v68_v18 }
  0xbf   :  { %138 = vrsqrt.f32 %v54_v19 }
  0xc4   :  { %v133_v20 = vpop.eup %132 }
  0xc5   :  { %v135_v21 = vpop.eup %134  ;;  %v71_v22 = vmul.f32 3.1622777, %v133_v20 }
  0xc6   :  { %v57_v23 = vmul.f32 3.1622777, %v135_v21 }
  0xc7   :  { %v86_v24 = vmul.f32 %v71_v22, %v42_v0 }
  0xc8   :  { %v137_v25 = vpop.eup %136  ;;  %v73_v26 = vmul.f32 %v57_v23, %v40_v1 }
  0xc9   :  { %v139_v27 = vpop.eup %138  ;;  %v123_v28 = vpack.c.bf16 %v86_v24, %v86_v24  ;;  %v72_v29 = vmul.f32 3.1622777, %v137_v25 }
  0xca   :  { %v121_v30 = vpack.c.bf16 %v73_v26, %v73_v26  ;;  %v58_v31 = vmul.f32 3.1622777, %v139_v27 }
  0xcb   :  { %97 = vst.msk [vmem:[#allocation7 + $0x8] sm:$0xf] %vm83_vm1, %v123_v28  ;;  %v87_v32 = vmul.f32 %v72_v29, %v43_v2 }
  0xcc   :  { %84 = vst.msk [vmem:[#allocation7] sm:$0xf] %vm83_vm1, %v121_v30  ;;  %v74_v33 = vmul.f32 %v58_v31, %v41_v6 }
  0xcd   :  { %v124_v34 = vpack.c.bf16 %v87_v32, %v87_v32 }
  0xce   :  { %v122_v35 = vpack.c.bf16 %v74_v33, %v74_v33 }
  0xcf   :  { %98 = vst.msk [vmem:[#allocation7 + $0xc] sm:$0xf] %vm83_vm1, %v124_v34 }
  0xd0   :  { %85 = vst.msk [vmem:[#allocation7 + $0x4] sm:$0xf] %vm83_vm1, %v122_v35 }
  0xd1   :  { %195 = shalt.err (!%p192_p6)
}
  0xd2   :  { %s196_s10 = scalar_lea.hbm %s276_s2, 256 }
  0xd3   :  { %p197_p7 = scmp.ne.s32.totalorder %s276_s2, %s196_s10  ;;  %p200_p8 = scmp.lt.u32.totalorder %s196_s10, %s276_s2 }
  0xd5   :  { %p202_p9 = pnand %p200_p8, %p197_p7 }
  0xd7   :  { %205 = shalt.err (!%p202_p9)
}
  0xd8   :  { %s217_s15 = smov 64   ;;  %s218_s16 = smov 4  }
  0xd9   :  { %110 = dma.vmem_to_hbm [thread:$0]  %s105_s6, 256, %s276_s2, [#allocation4], %s217_s15, %s217_s15, %s218_s16  }
  0xda   :  { %210 = dma.done.wait [#allocation4], 256  }
  0xdb   :  { %211 = vsyncadd [#allocation4], 4294967040 }
  0xdc   :  { %114 = vsyncpa [#allocation3], 1 }
  0xdd   :  { %115 = vsyncpa [#allocation6], 1 }
  0xde   :  { %116 = vsyncpa [#allocation4], 1 }

</bundles_post_ra>
